<compile_context>
chip_gen: v7x
topology: tpu7x:2x2x1
jax: 0.10.0
libtpu: 0.0.40
codegen_flags: <defaults>
</compile_context>

<pallas_src>
import math
from functools import lru_cache

import numpy as np
import jax
import jax.numpy as jnp
from jax.experimental import pallas as pl
from jax.experimental.pallas import tpu as pltpu


# ----------------------------- host-side weights -----------------------------

@lru_cache(maxsize=None)
def _interp_matrix_np(n_in: int, n_out: int) -> np.ndarray:
    """(n_out, n_in) linear-interp matrix, align_corners=True semantics."""
    if n_in == 1:
        return np.ones((n_out, 1), np.float32)
    w = np.zeros((n_out, n_in), np.float32)
    src = np.arange(n_out, dtype=np.float64) * (n_in - 1) / (n_out - 1)
    lo = np.clip(np.floor(src).astype(np.int64), 0, n_in - 2)
    frac = (src - lo).astype(np.float32)
    rows = np.arange(n_out)
    w[rows, lo] += (1.0 - frac)
    w[rows, lo + 1] += frac
    return w


@lru_cache(maxsize=None)
def _sep_weights(D: int, H: int, W: int, cblk: int):
    """Returns (whw_t, bigwd) as device-resident constants.

    whw_t : (H*W, Ho*Wo)            = kron(wh, ww).T
    bigwd : (cblk*Do, cblk*D)       = kron(I_cblk, wd)   (block-diag D interp)
    """
    wd = _interp_matrix_np(D, 2 * D)
    wh = _interp_matrix_np(H, 2 * H)
    ww = _interp_matrix_np(W, 2 * W)
    whw_t = np.ascontiguousarray(np.kron(wh, ww).T)
    bigwd = np.kron(np.eye(cblk, dtype=np.float32), wd)
    return jnp.asarray(whw_t), jnp.asarray(bigwd)


@lru_cache(maxsize=None)
def _kron_weight(D: int, H: int, W: int):
    """(D*H*W, Do*Ho*Wo) fully-fused trilinear weight, transposed."""
    wd = _interp_matrix_np(D, 2 * D)
    wh = _interp_matrix_np(H, 2 * H)
    ww = _interp_matrix_np(W, 2 * W)
    w_full_t = np.ascontiguousarray(np.kron(wd, np.kron(wh, ww)).T)
    return jnp.asarray(w_full_t)


# --------------------------------- kernels -----------------------------------

def _kron_kernel(x_ref, w_ref, o_ref):
    # x_ref: (cblk, DHW)   w_ref: (DHW, DoHoWo)   o_ref: (cblk, DoHoWo)
    o_ref[...] = jnp.dot(x_ref[...].astype(jnp.float32), w_ref[...],
                         preferred_element_type=jnp.float32).astype(o_ref.dtype)


def _sep_kernel(x_ref, bigwd_ref, whw_t_ref, o_ref, y_ref):
    # x_ref:     (cblk*D,  HW)
    # bigwd_ref: (cblk*Do, cblk*D)       -- kron(I_cblk, wd), VMEM-resident
    # whw_t_ref: (HW, col_blk)           -- column tile of kron(wh, ww).T
    # o_ref:     (cblk*Do, col_blk)
    # y_ref:     (cblk*Do, HW) f32 scratch (D-interp result, reused over cols)
    @pl.when(pl.program_id(1) == 0)
    def _():
        y_ref[...] = jnp.dot(bigwd_ref[...], x_ref[...].astype(jnp.float32),
                             preferred_element_type=jnp.float32)

    o_ref[...] = jnp.dot(y_ref[...], whw_t_ref[...],
                         preferred_element_type=jnp.float32).astype(o_ref.dtype)


# ------------------------------- tiling helpers -------------------------------

def _pick_col_blk(HW: int, HoWo: int, max_bytes: int) -> int:
    """Largest column tile of whw_t (multiple of 128, divisor of HoWo) fitting
    max_bytes; HoWo itself if the full weight fits."""
    if HW * HoWo * 4 <= max_bytes:
        return HoWo
    if HoWo % 128 != 0:
        # TODO(synk): non-128-multiple HoWo would need padded column tiles.
        return HoWo
    best = 128
    c = 256
    while c < HoWo:
        if HoWo % c == 0 and HW * c * 4 <= max_bytes:
            best = c
        c += 128
    return best


def _vmem_limit(est_bytes: int) -> int:
    # Permissive but leaves headroom on v7x (64 MiB physical).
    return int(min(48 << 20, max(2 * est_bytes, 32 << 20)))


# --------------------------------- wrapper ------------------------------------

def up_1_trilinear(x: jnp.ndarray, *, force_separable: bool = False,
                   max_resident_whw_bytes: int = 6 << 20) -> jnp.ndarray:
    """Trilinear upsample x2, align_corners=True. x: (N, C, D, H, W)."""
    N, C, D, H, W = x.shape
    Do, Ho, Wo = 2 * D, 2 * H, 2 * W
    NC = N * C
    DHW, HW = D * H * W, H * W
    DoHoWo, HoWo = Do * Ho * Wo, Ho * Wo

    if NC == 0:
        return jnp.zeros((N, C, Do, Ho, Wo), x.dtype)

    kron_bytes = 4 * DHW * DoHoWo
    act_bytes = 4 * NC * (DHW + DoHoWo)
    use_kron = (not force_separable) and kron_bytes <= min(8 << 20, act_bytes)

    # ---------------- fused-kron path (huge NC, tiny volume) ----------------
    if use_kron:
        w_t = _kron_weight(D, H, W)                              # (DHW, DoHoWo)
        cap = max(8, (4 << 20) // max(DoHoWo * 4, 1))            # ~4 MiB out tile
        cblk = min(256, cap, NC)
        cblk = ((cblk + 7) // 8) * 8                             # sublane multiple
        g = -(-NC // cblk)
        NCp = g * cblk

        x2 = x.reshape(NC, DHW)
        if NCp != NC:
            x2 = jnp.pad(x2, ((0, NCp - NC), (0, 0)))

        est = kron_bytes + 2 * cblk * (DHW + DoHoWo) * 4
        sem = "parallel" if (g >= 4 and act_bytes >= 2 * kron_bytes) else "arbitrary"

        out = pl.pallas_call(
            _kron_kernel,
            out_shape=jax.ShapeDtypeStruct((NCp, DoHoWo), x.dtype),
            grid_spec=pltpu.PrefetchScalarGridSpec(
                num_scalar_prefetch=0,
                grid=(g,),
                in_specs=[
                    pl.BlockSpec((cblk, DHW), lambda i: (i, 0)),
                    pl.BlockSpec((DHW, DoHoWo), lambda i: (0, 0)),   # resident
                ],
                out_specs=pl.BlockSpec((cblk, DoHoWo), lambda i: (i, 0)),
            ),
            compiler_params=pltpu.CompilerParams(
                dimension_semantics=(sem,),
                vmem_limit_bytes=_vmem_limit(est)),
        )(x2, w_t)
        if NCp != NC:
            out = out[:NC]
        return out.reshape(N, C, Do, Ho, Wo)

    # ---------------- separable path (default) ----------------
    # Channel block so the H/W matmul has M = cblk*Do >= 256 where NC allows,
    # while the output tile stays ~4 MiB.
    m = 8 // math.gcd(D, 8)                       # cblk multiple -> cblk*D % 8 == 0
    want = -(-256 // Do)
    cap = max(1, (4 << 20) // max(Do * HoWo * 4, 1))
    cblk = max(1, min(want, cap, NC))
    cblk = -(-cblk // m) * m
    g = -(-NC // cblk)
    NCp = g * cblk

    whw_t, bigwd = _sep_weights(D, H, W, cblk)

    col_blk = _pick_col_blk(HW, HoWo, max_resident_whw_bytes)
    gcol = HoWo // col_blk

    x2 = x.reshape(NC * D, HW)
    if NCp != NC:
        x2 = jnp.pad(x2, ((0, (NCp - NC) * D), (0, 0)))

    weight_bytes = HW * HoWo * 4 + int(bigwd.size) * 4
    est = (2 * (HW * col_blk * 4 + int(bigwd.size) * 4)
           + 2 * (cblk * D * HW * 4 + cblk * Do * col_blk * 4)
           + cblk * Do * HW * 4)
    total_act = 4 * NC * (D * HW + Do * HoWo)
    sem0 = "parallel" if (g >= 4 and total_act >= 2 * weight_bytes) else "arbitrary"

    out = pl.pallas_call(
        _sep_kernel,
        out_shape=jax.ShapeDtypeStruct((NCp * Do, HoWo), x.dtype),
        grid_spec=pltpu.PrefetchScalarGridSpec(
            num_scalar_prefetch=0,
            grid=(g, gcol),
            in_specs=[
                pl.BlockSpec((cblk * D, HW), lambda i, j: (i, 0)),
                pl.BlockSpec((cblk * Do, cblk * D), lambda i, j: (0, 0)),  # resident
                pl.BlockSpec((HW, col_blk), lambda i, j: (0, j)),
            ],
            out_specs=pl.BlockSpec((cblk * Do, col_blk), lambda i, j: (i, j)),
            scratch_shapes=[pltpu.VMEM((cblk * Do, HW), jnp.float32)],
        ),
        compiler_params=pltpu.CompilerParams(
            dimension_semantics=(sem0, "arbitrary"),
            vmem_limit_bytes=_vmem_limit(est)),
    )(x2, bigwd, whw_t)
    if NCp != NC:
        out = out[:NC * Do]
    return out.reshape(N, C, Do, Ho, Wo)


# -------------------------------- reference -----------------------------------

def _reference(x: jnp.ndarray) -> jnp.ndarray:
    """Pure-JAX reference using the same per-axis interpolation matrices."""
    N, C, D, H, W = x.shape
    wd = jnp.asarray(_interp_matrix_np(D, 2 * D))
    wh = jnp.asarray(_interp_matrix_np(H, 2 * H))
    ww = jnp.asarray(_interp_matrix_np(W, 2 * W))
    y = jnp.einsum('od,ncdhw->ncohw', wd, x.astype(jnp.float32))
    y = jnp.einsum('ph,ncdhw->ncdpw', wh, y)
    y = jnp.einsum('qw,ncdhw->ncdhq', ww, y)
    return y.astype(x.dtype)


if __name__ == "__main__":
    key = jax.random.PRNGKey(0)
    k1, k2 = jax.random.split(key)

    # 1) Stated small workload: batch=2, channels=4, D=H=W=8 -> (2,4,16,16,16).
    #    Amortization gate routes this to the channel-blocked separable path.
    x = jax.random.normal(k1, (2, 4, 8, 8, 8), dtype=jnp.float32)
    out = jax.block_until_ready(up_1_trilinear(x))
    ref = _reference(x)
    assert out.shape == (2, 4, 16, 16, 16), out.shape
    assert jnp.allclose(out, ref, atol=1e-5, rtol=1e-5), "separable path mismatch"

    # 2) Column-tiled separable variant (small whw residency budget forces the
    #    HoWo streaming path with scratch reuse).
    out_tiled = jax.block_until_ready(
        up_1_trilinear(x, max_resident_whw_bytes=64 << 10))
    assert jnp.allclose(out_tiled, ref, atol=1e-5, rtol=1e-5), "col-tiled mismatch"

    # 3) Fused-kron path: large NC, tiny volume, so the weight read amortizes.
    x_big_nc = jax.random.normal(k2, (2, 96, 4, 4, 4), dtype=jnp.float32)
    out_kron = jax.block_until_ready(up_1_trilinear(x_big_nc))
    ref_kron = _reference(x_big_nc)
    assert out_kron.shape == (2, 96, 8, 8, 8), out_kron.shape
    assert jnp.allclose(out_kron, ref_kron, atol=1e-5, rtol=1e-5), "kron path mismatch"

    print("KERNEL_OK")
</pallas_src>

<mosaic_0001>
module attributes {stable_mosaic.version = 11 : i64} {
  func.func @_sep_kernel(%arg0: i32, %arg1: i32, %arg2: memref<64x64xf32, #tpu.memory_space<vmem>>, %arg3: memref<128x64xf32, #tpu.memory_space<vmem>>, %arg4: memref<64x256xf32, #tpu.memory_space<vmem>>, %arg5: memref<128x256xf32, #tpu.memory_space<vmem>>, %arg6: memref<128x64xf32, #tpu.memory_space<vmem>>) attributes {dimension_semantics = [#tpu.dimension_semantics<arbitrary>, #tpu.dimension_semantics<arbitrary>], iteration_bounds = array<i64: 1, 1>, scalar_prefetch = 0 : i64, scratch_operands = 1 : i64, tpu.core_type = #tpu.core_type<tc>, window_params = [{transform_indices = @transform_0, window_bounds = array<i64: 64, 64>}, {pipeline_mode = #tpu.pipeline_mode<synchronous>, transform_indices = @transform_1, window_bounds = array<i64: 128, 64>}, {transform_indices = @transform_2, window_bounds = array<i64: 64, 256>}, {transform_indices = @transform_3, window_bounds = array<i64: 128, 256>}]} {
    %c0_i32 = arith.constant 0 : i32
    %0 = arith.cmpi eq, %arg1, %c0_i32 : i32
    %1 = arith.extui %0 : i1 to i32
    %c0_i32_0 = arith.constant 0 : i32
    %2 = arith.cmpi ne, %1, %c0_i32_0 : i32
    scf.if %2 {
      %c0_6 = arith.constant 0 : index
      %c0_7 = arith.constant 0 : index
      %7 = vector.load %arg3[%c0_6, %c0_7] : memref<128x64xf32, #tpu.memory_space<vmem>>, vector<128x64xf32>
      %c0_8 = arith.constant 0 : index
      %c0_9 = arith.constant 0 : index
      %8 = vector.load %arg2[%c0_8, %c0_9] : memref<64x64xf32, #tpu.memory_space<vmem>>, vector<64x64xf32>
      %cst_10 = arith.constant dense<0.000000e+00> : vector<128x64xf32>
      %9 = tpu.matmul %7, %8, %cst_10 {dimension_numbers = #tpu.dot_dimension_numbers<[1], [0], [0], [1], [0, 0, 1, 1], [], []>} : vector<128x64xf32>, vector<64x64xf32>, vector<128x64xf32> -> vector<128x64xf32>
      %c0_11 = arith.constant 0 : index
      %c0_12 = arith.constant 0 : index
      %10 = vector.load %arg6[%c0_11, %c0_12] : memref<128x64xf32, #tpu.memory_space<vmem>>, vector<128x64xf32>
      tpu.vector_store %arg6[%c0_11, %c0_12], %9 {strides = array<i32>} : memref<128x64xf32, #tpu.memory_space<vmem>>, vector<128x64xf32>,
    } else {
    }
    %c0 = arith.constant 0 : index
    %c0_1 = arith.constant 0 : index
    %3 = vector.load %arg6[%c0, %c0_1] : memref<128x64xf32, #tpu.memory_space<vmem>>, vector<128x64xf32>
    %c0_2 = arith.constant 0 : index
    %c0_3 = arith.constant 0 : index
    %4 = vector.load %arg4[%c0_2, %c0_3] : memref<64x256xf32, #tpu.memory_space<vmem>>, vector<64x256xf32>
    %cst = arith.constant dense<0.000000e+00> : vector<128x256xf32>
    %5 = tpu.matmul %3, %4, %cst {dimension_numbers = #tpu.dot_dimension_numbers<[1], [0], [0], [1], [0, 0, 1, 1], [], []>} : vector<128x64xf32>, vector<64x256xf32>, vector<128x256xf32> -> vector<128x256xf32>
    %c0_4 = arith.constant 0 : index
    %c0_5 = arith.constant 0 : index
    %6 = vector.load %arg5[%c0_4, %c0_5] : memref<128x256xf32, #tpu.memory_space<vmem>>, vector<128x256xf32>
    tpu.vector_store %arg5[%c0_4, %c0_5], %5 {strides = array<i32>} : memref<128x256xf32, #tpu.memory_space<vmem>>, vector<128x256xf32>,
    return
  }
  func.func @transform_0(%arg0: i32, %arg1: i32) -> (i32, i32) {
    %c0_i32 = arith.constant 0 : i32
    %c0_i32_0 = arith.constant 0 : i32
    return %arg0, %c0_i32 : i32, i32
  }
  func.func @transform_1(%arg0: i32, %arg1: i32) -> (i32, i32) {
    %c0_i32 = arith.constant 0 : i32
    %c0_i32_0 = arith.constant 0 : i32
    %c0_i32_1 = arith.constant 0 : i32
    return %c0_i32, %c0_i32_0 : i32, i32
  }
  func.func @transform_2(%arg0: i32, %arg1: i32) -> (i32, i32) {
    %c0_i32 = arith.constant 0 : i32
    %c0_i32_0 = arith.constant 0 : i32
    return %c0_i32, %arg1 : i32, i32
  }
  func.func @transform_3(%arg0: i32, %arg1: i32) -> (i32, i32) {
    %c0_i32 = arith.constant 0 : i32
    return %arg0, %arg1 : i32, i32
  }
}

</mosaic_0001>

<bundles_post_ra>
// kernel: tpu_custom_call.1
= control target key start
LH: loop header
LB: loop body
LE: loop exit
PB: predicated region body
PF: predicated region fallthrough
CT: control target
= control target key end

     0   :  { %vm43_vm0 = vcmask 523264   ;;  %s927_s0 = inlined_call_operand.vmem [shape: f32[64,64], index: 0, kind: input, shape index: {}]   ;;  %s928_s1 = inlined_call_operand.vmem [shape: f32[128,64], index: 1, kind: input, shape index: {}]   ;;  %s929_s2 = inlined_call_operand.vmem [shape: f32[64,256], index: 2, kind: input, shape index: {}]   ;;  %s930_s3 = inlined_call_operand.hbm [shape: f32[128,256], index: 3, kind: output, shape index: {}]  }
   0x1   :  { %v35_v0 = vld [vmem:[%s927_s0] sm:$0xff]  ;;  %v36_v1 = vld [vmem:[%s927_s0 + $0x8] sm:$0xff]  ;;  %v37_v2 = vld [vmem:[%s927_s0 + $0x10] sm:$0xff] }
   0x2   :  { %v639_v3 = vpack.c.bf16 %v36_v1, %v35_v0  ;;  %v38_v4 = vld [vmem:[%s927_s0 + $0x18] sm:$0xff]  ;;  %v39_v6 = vld [vmem:[%s927_s0 + $0x20] sm:$0xff]  ;;  %v40_v7 = vld [vmem:[%s927_s0 + $0x28] sm:$0xff] }
   0x3   :  { %v643_v5 = vpack.c.bf16 %v38_v4, %v37_v2  ;;  %v19_v8 = vld [vmem:[%s928_s1] sm:$0xff]  ;;  %v647_v9 = vpack.c.bf16 %v40_v7, %v39_v6  ;;  %v41_v10 = vld [vmem:[%s927_s0 + $0x30] sm:$0xff]  ;;  %v42_v11 = vld [vmem:[%s927_s0 + $0x38] sm:$0xff] }
   0x4   :  { %640 = vmatprep.subr.bf16.mxu0 %v639_v3  ;;  %615 = vmatprep.mubr.msk.f32.mxu0 %vm43_vm0, %v19_v8  ;;  %v270_v12 = vld [vmem:[%s929_s2 + $0x8] sm:$0xff]  ;;  %v272_v13 = vld [vmem:[%s929_s2 + $0x18] sm:$0xff]  ;;  %v269_v14 = vld [vmem:[%s929_s2] sm:$0xff]  ;;  %v651_v15 = vpack.c.bf16 %v42_v11, %v41_v10 }
   0x5   :  { %642 = vmatpush3.bf16.msra.mxu0 %v639_v3  ;;  %v655_v16 = vpack.c.bf16 %v272_v13, %v270_v12  ;;  %v271_v17 = vld [vmem:[%s929_s2 + $0x10] sm:$0xff]  ;;  %v274_v18 = vld [vmem:[%s929_s2 + $0x28] sm:$0xff]  ;;  %v276_v19 = vld [vmem:[%s929_s2 + $0x38] sm:$0xff] }
   0x6   :  { %644 = vmatprep.subr.bf16.mxu0 %v643_v5  ;;  %v657_v20 = vpack.c.bf16 %v271_v17, %v269_v14 }
   0x9   :  { %646 = vmatpush3.bf16.msra.mxu0 %v643_v5 }
   0xa   :  { %648 = vmatprep.subr.bf16.mxu0 %v647_v9 }
   0xb   :  { %8 = vsyncpa [#allocation4], 0  ;;  %v659_v21 = vpack.c.bf16 %v276_v19, %v274_v18  ;;  %v273_v22 = vld [vmem:[%s929_s2 + $0x20] sm:$0xff]  ;;  %v275_v23 = vld [vmem:[%s929_s2 + $0x30] sm:$0xff]  ;;  %671 = vmatprep.subr.bf16.mxu1 %v655_v16  ;;  %v707_v52 = vmov 0.0  }
   0xc   :  { %675 = vmatpush1.bf16.msra.mxu1 %v657_v20  ;;  %v661_v24 = vpack.c.bf16 %v275_v23, %v273_v22  ;;  %v20_v25 = vld [vmem:[%s928_s1 + $0x8] sm:$0xff]  ;;  %v21_v26 = vld [vmem:[%s928_s1 + $0x10] sm:$0xff]  ;;  %v22_v27 = vld [vmem:[%s928_s1 + $0x18] sm:$0xff]  ;;  %422 = vmatprep.mubr.f32.mxu1 %v707_v52 }
   0xd   :  { %650 = vmatpush3.bf16.msra.mxu0 %v647_v9  ;;  %672 = vmatprep.subr.bf16.mxu1 %v659_v21  ;;  %v23_v28 = vld [vmem:[%s928_s1 + $0x20] sm:$0xff]  ;;  %v24_v29 = vld [vmem:[%s928_s1 + $0x28] sm:$0xff]  ;;  %v25_v30 = vld [vmem:[%s928_s1 + $0x30] sm:$0xff] }
   0xe   :  { %652 = vmatprep.subr.bf16.mxu0 %v651_v15  ;;  %v26_v31 = vld [vmem:[%s928_s1 + $0x38] sm:$0xff]  ;;  %v27_v32 = vld [vmem:[%s928_s1 + $0x40] sm:$0xff]  ;;  %v28_v33 = vld [vmem:[%s928_s1 + $0x48] sm:$0xff] }
   0xf   :  { %v29_v34 = vld [vmem:[%s928_s1 + $0x50] sm:$0xff]  ;;  %v30_v35 = vld [vmem:[%s928_s1 + $0x58] sm:$0xff]  ;;  %v31_v36 = vld [vmem:[%s928_s1 + $0x60] sm:$0xff] }
  0x10   :  { %676 = vmatpush1.bf16.msra.mxu1 %v661_v24  ;;  %v32_v37 = vld [vmem:[%s928_s1 + $0x68] sm:$0xff]  ;;  %v33_v38 = vld [vmem:[%s928_s1 + $0x70] sm:$0xff]  ;;  %v34_v39 = vld [vmem:[%s928_s1 + $0x78] sm:$0xff] }
  0x11   :  { %654 = vmatpush3.bf16.msra.mxu0 %v651_v15  ;;  %v278_v40 = vld [vmem:[%s929_s2 + $0x48] sm:$0xff]  ;;  %v280_v41 = vld [vmem:[%s929_s2 + $0x58] sm:$0xff]  ;;  %v277_v43 = vld [vmem:[%s929_s2 + $0x40] sm:$0xff] }
  0x12   :  { %656 = vmatprep.subr.bf16.mxu0 %v655_v16  ;;  %v663_v42 = vpack.c.bf16 %v280_v41, %v278_v40  ;;  %v279_v44 = vld [vmem:[%s929_s2 + $0x50] sm:$0xff]  ;;  %v282_v46 = vld [vmem:[%s929_s2 + $0x68] sm:$0xff]  ;;  %v284_v47 = vld [vmem:[%s929_s2 + $0x78] sm:$0xff] }
  0x13   :  { %v665_v45 = vpack.c.bf16 %v279_v44, %v277_v43  ;;  %v667_v48 = vpack.c.bf16 %v284_v47, %v282_v46  ;;  %v281_v49 = vld [vmem:[%s929_s2 + $0x60] sm:$0xff]  ;;  %v283_v50 = vld [vmem:[%s929_s2 + $0x70] sm:$0xff]  ;;  %s708_s2 = smov [#allocation3]  }
  0x14   :  { %616 = vmatmul.mubr.msk.f32.vlgmr.msra.gmra.mrb[0].mxu0 %vm43_vm0, %v20_v25  ;;  %673 = vmatprep.subr.bf16.mxu1 %v663_v42  ;;  %v669_v51 = vpack.c.bf16 %v283_v50, %v281_v49  ;;  %s532_s8 = sshll.u32 %s708_s2, 4  ;;  %s533_s8 = int_to_ptr.vmem [resolvable:$true] %s532_s8 }
  0x15   :  { %618 = vmatprep.mubr.msk.f32.mxu0 %vm43_vm0, %v21_v26  ;;  %658 = vmatpush1.bf16.msra.mxu0 %v657_v20  ;;  %s683_s9 = scalar_lea.vmem %s533_s8, 4096  ;;  %p688_p1 = scmp.lt.s32.totalorder %s533_s8, %s533_s8 }
  0x16   :  { %660 = vmatprep.subr.bf16.mxu0 %v659_v21  ;;  %677 = vmatpush1.bf16.msra.mxu1 %v665_v45  ;;  %p684_p0 = scmp.ne.s32.totalorder %s533_s8, %s683_s9  ;;  %p689_p2 = scmp.lt.s32.totalorder %s683_s9, %s683_s9 }
  0x17   :  { %674 = vmatprep.subr.bf16.mxu1 %v667_v48 }
  0x18   :  { %619 = vmatmul.mubr.msk.f32.gmra.mrb[2].mxu0 %vm43_vm0, %v22_v27  ;;  %p690_p3 = por %p689_p2, %p688_p1 }
  0x19   :  { %621 = vmatprep.mubr.msk.f32.mxu0 %vm43_vm0, %v23_v28  ;;  %662 = vmatpush1.bf16.msra.mxu0 %v661_v24 }
  0x1a   :  { %664 = vmatprep.subr.bf16.mxu0 %v663_v42  ;;  %678 = vmatpush1.bf16.msra.mxu1 %v669_v51  ;;  %p691_p4 = pnand %p690_p3, %p684_p0 }
  0x1c   :  { %622 = vmatmul.mubr.msk.f32.gmra.mrb[4].mxu0 %vm43_vm0, %v24_v29 }
  0x1d   :  { %624 = vmatprep.mubr.msk.f32.mxu0 %vm43_vm0, %v25_v30  ;;  %666 = vmatpush1.bf16.msra.mxu0 %v665_v45 }
  0x1e   :  { %668 = vmatprep.subr.bf16.mxu0 %v667_v48 }
  0x20   :  { %625 = vmatmul.mubr.msk.f32.gmra.mrb[6].mxu0 %vm43_vm0, %v26_v31 }
  0x21   :  { %627 = vmatprep.mubr.msk.f32.mxu0 %vm43_vm0, %v27_v32  ;;  %670 = vmatpush1.bf16.msra.mxu0 %v669_v51 }
  0x24   :  { %628 = vmatmul.mubr.msk.f32.gmra.mrb[8].mxu0 %vm43_vm0, %v28_v33 }
  0x25   :  { %630 = vmatprep.mubr.msk.f32.mxu0 %vm43_vm0, %v29_v34 }
  0x28   :  { %631 = vmatmul.mubr.msk.f32.gmra.mrb[10].mxu0 %vm43_vm0, %v30_v35 }
  0x29   :  { %633 = vmatprep.mubr.msk.f32.mxu0 %vm43_vm0, %v31_v36 }
  0x2c   :  { %634 = vmatmul.mubr.msk.f32.gmra.mrb[12].mxu0 %vm43_vm0, %v32_v37 }
  0x2d   :  { %636 = vmatprep.mubr.msk.f32.mxu0 %vm43_vm0, %v33_v38 }
  0x30   :  { %637 = vmatmul.mubr.msk.f32.gmra.mrb[14].mxu0 %vm43_vm0, %v34_v39 }
  0x31   :  { %398 = vmatprep.mubr.f32.mxu0 %v707_v52 }
  0xe7   :  { %v617_v53 = vpop.f32.mrb[0].mxu0 }
  0xe8   :  { %238 = vst.msk [vmem:[#allocation2 + $0x8] sm:$0xff] %vm43_vm0, %v617_v53  ;;  %v158_v54 = vpop.f32.mrb[1].mxu0 }
  0xe9   :  { %237 = vst.msk [vmem:[#allocation2] sm:$0xff] %vm43_vm0, %v158_v54 }
  0xeb   :  { %v620_v55 = vpop.f32.mrb[2].mxu0 }
  0xec   :  { %240 = vst.msk [vmem:[#allocation2 + $0x18] sm:$0xff] %vm43_vm0, %v620_v55  ;;  %v168_v56 = vpop.f32.mrb[3].mxu0 }
  0xed   :  { %239 = vst.msk [vmem:[#allocation2 + $0x10] sm:$0xff] %vm43_vm0, %v168_v56 }
  0xef   :  { %v623_v57 = vpop.f32.mrb[4].mxu0  ;;  %v254_v61 = vld [vmem:[#allocation2 + $0x8] sm:$0xff] }
  0xf0   :  { %242 = vst.msk [vmem:[#allocation2 + $0x28] sm:$0xff] %vm43_vm0, %v623_v57  ;;  %v178_v58 = vpop.f32.mrb[5].mxu0  ;;  %v253_v59 = vld [vmem:[#allocation2] sm:$0xff] }
  0xf1   :  { %241 = vst.msk [vmem:[#allocation2 + $0x20] sm:$0xff] %vm43_vm0, %v178_v58  ;;  %559 = vmatmul.mubr.msk.f32.vlgmr.msra.gmra.mrb[16].mxu0 %vm43_vm0, %v253_v59 }
  0xf2   :  { %404 = vmatprep.mubr.f32.mxu0 %v707_v52 }
  0xf3   :  { %v626_v60 = vpop.f32.mrb[6].mxu0  ;;  %v256_v4 = vld [vmem:[#allocation2 + $0x18] sm:$0xff] }
  0xf4   :  { %244 = vst.msk [vmem:[#allocation2 + $0x38] sm:$0xff] %vm43_vm0, %v626_v60  ;;  %v188_v62 = vpop.f32.mrb[7].mxu0  ;;  %v255_v0 = vld [vmem:[#allocation2 + $0x10] sm:$0xff] }
  0xf5   :  { %560 = vmatmul.mubr.msk.f32.gmra.mrb[18].mxu0 %vm43_vm0, %v254_v61  ;;  %243 = vst.msk [vmem:[#allocation2 + $0x30] sm:$0xff] %vm43_vm0, %v188_v62 }
  0xf6   :  { %410 = vmatprep.mubr.f32.mxu0 %v707_v52 }
  0xf7   :  { %v629_v63 = vpop.f32.mrb[8].mxu0  ;;  %v258_v5 = vld [vmem:[#allocation2 + $0x28] sm:$0xff] }
  0xf8   :  { %v257_v1 = vld [vmem:[#allocation2 + $0x20] sm:$0xff]  ;;  %246 = vst.msk [vmem:[#allocation2 + $0x48] sm:$0xff] %vm43_vm0, %v629_v63  ;;  %v198_v2 = vpop.f32.mrb[9].mxu0 }
  0xf9   :  { %561 = vmatmul.mubr.msk.f32.gmra.mrb[20].mxu0 %vm43_vm0, %v255_v0  ;;  %563 = vmatmul.mubr.msk.f32.vlgmr.msra.gmra.mrb[0].mxu1 %vm43_vm0, %v257_v1  ;;  %245 = vst.msk [vmem:[#allocation2 + $0x40] sm:$0xff] %vm43_vm0, %v198_v2 }
  0xfa   :  { %416 = vmatprep.mubr.f32.mxu0 %v707_v52  ;;  %428 = vmatprep.mubr.f32.mxu1 %v707_v52 }
  0xfb   :  { %v632_v3 = vpop.f32.mrb[10].mxu0  ;;  %v260_v11 = vld [vmem:[#allocation2 + $0x38] sm:$0xff] }
  0xfc   :  { %248 = vst.msk [vmem:[#allocation2 + $0x58] sm:$0xff] %vm43_vm0, %v632_v3  ;;  %v208_v6 = vpop.f32.mrb[11].mxu0  ;;  %v259_v7 = vld [vmem:[#allocation2 + $0x30] sm:$0xff] }
  0xfd   :  { %562 = vmatmul.mubr.msk.f32.gmra.mrb[22].mxu0 %vm43_vm0, %v256_v4  ;;  %564 = vmatmul.mubr.msk.f32.gmra.mrb[2].mxu1 %vm43_vm0, %v258_v5  ;;  %247 = vst.msk [vmem:[#allocation2 + $0x50] sm:$0xff] %vm43_vm0, %v208_v6 }
  0xfe   :  { %434 = vmatprep.mubr.f32.mxu1 %v707_v52 }
  0xff   :  { %v635_v8 = vpop.f32.mrb[12].mxu0  ;;  %v262_v14 = vld [vmem:[#allocation2 + $0x48] sm:$0xff] }
 0x100   :  { %250 = vst.msk [vmem:[#allocation2 + $0x68] sm:$0xff] %vm43_vm0, %v635_v8  ;;  %v218_v9 = vpop.f32.mrb[13].mxu0  ;;  %v261_v13 = vld [vmem:[#allocation2 + $0x40] sm:$0xff] }
 0x101   :  { %565 = vmatmul.mubr.msk.f32.gmra.mrb[4].mxu1 %vm43_vm0, %v259_v7  ;;  %249 = vst.msk [vmem:[#allocation2 + $0x60] sm:$0xff] %vm43_vm0, %v218_v9 }
 0x102   :  { %440 = vmatprep.mubr.f32.mxu1 %v707_v52 }
 0x103   :  { %v638_v10 = vpop.f32.mrb[14].mxu0  ;;  %v264_v16 = vld [vmem:[#allocation2 + $0x58] sm:$0xff] }
 0x104   :  { %252 = vst.msk [vmem:[#allocation2 + $0x78] sm:$0xff] %vm43_vm0, %v638_v10  ;;  %v228_v12 = vpop.f32.mrb[15].mxu0  ;;  %v263_v15 = vld [vmem:[#allocation2 + $0x50] sm:$0xff] }
 0x105   :  { %566 = vmatmul.mubr.msk.f32.gmra.mrb[6].mxu1 %vm43_vm0, %v260_v11  ;;  %251 = vst.msk [vmem:[#allocation2 + $0x70] sm:$0xff] %vm43_vm0, %v228_v12 }
 0x106   :  { %446 = vmatprep.mubr.f32.mxu1 %v707_v52 }
 0x107   :  { %v266_v18 = vld [vmem:[#allocation2 + $0x68] sm:$0xff] }
 0x108   :  { %v265_v17 = vld [vmem:[#allocation2 + $0x60] sm:$0xff] }
 0x109   :  { %567 = vmatmul.mubr.msk.f32.gmra.mrb[8].mxu1 %vm43_vm0, %v261_v13 }
 0x10a   :  { %452 = vmatprep.mubr.f32.mxu1 %v707_v52 }
 0x10b   :  { %v268_v20 = vld [vmem:[#allocation2 + $0x78] sm:$0xff] }
 0x10c   :  { %v267_v19 = vld [vmem:[#allocation2 + $0x70] sm:$0xff] }
 0x10d   :  { %568 = vmatmul.mubr.msk.f32.gmra.mrb[10].mxu1 %vm43_vm0, %v262_v14 }
 0x10e   :  { %458 = vmatprep.mubr.f32.mxu1 %v707_v52 }
 0x111   :  { %569 = vmatmul.mubr.msk.f32.gmra.mrb[12].mxu1 %vm43_vm0, %v263_v15 }
 0x112   :  { %464 = vmatprep.mubr.f32.mxu1 %v707_v52 }
 0x115   :  { %570 = vmatmul.mubr.msk.f32.gmra.mrb[14].mxu1 %vm43_vm0, %v264_v16 }
 0x116   :  { %470 = vmatprep.mubr.f32.mxu1 %v707_v52 }
 0x119   :  { %571 = vmatmul.mubr.msk.f32.gmra.mrb[16].mxu1 %vm43_vm0, %v265_v17 }
 0x11a   :  { %476 = vmatprep.mubr.f32.mxu1 %v707_v52 }
 0x11d   :  { %572 = vmatmul.mubr.msk.f32.gmra.mrb[18].mxu1 %vm43_vm0, %v266_v18 }
 0x11e   :  { %482 = vmatprep.mubr.f32.mxu1 %v707_v52 }
 0x121   :  { %573 = vmatmul.mubr.msk.f32.gmra.mrb[20].mxu1 %vm43_vm0, %v267_v19 }
 0x122   :  { %488 = vmatprep.mubr.f32.mxu1 %v707_v52 }
 0x125   :  { %574 = vmatmul.mubr.msk.f32.gmra.mrb[22].mxu1 %vm43_vm0, %v268_v20 }
 0x1c4   :  { %v400_v21 = vpop.f32.mrb[16].mxu0 }
 0x1c5   :  { %495 = vst [vmem:[#allocation3] sm:$0xff] %v400_v21  ;;  %v402_v22 = vpop.f32.mrb[17].mxu0 }
 0x1c6   :  { %496 = vst [vmem:[#allocation3 + $0x8] sm:$0xff] %v402_v22 }
 0x1c8   :  { %v406_v23 = vpop.f32.mrb[18].mxu0 }
 0x1c9   :  { %497 = vst [vmem:[#allocation3 + $0x10] sm:$0xff] %v406_v23  ;;  %v408_v24 = vpop.f32.mrb[19].mxu0 }
 0x1ca   :  { %498 = vst [vmem:[#allocation3 + $0x18] sm:$0xff] %v408_v24 }
 0x1cc   :  { %v412_v25 = vpop.f32.mrb[20].mxu0  ;;  %v424_v26 = vpop.f32.mrb[0].mxu1 }
 0x1cd   :  { %499 = vst [vmem:[#allocation3 + $0x20] sm:$0xff] %v412_v25  ;;  %503 = vst [vmem:[#allocation3 + $0x40] sm:$0xff] %v424_v26  ;;  %v414_v27 = vpop.f32.mrb[21].mxu0  ;;  %v426_v28 = vpop.f32.mrb[1].mxu1 }
 0x1ce   :  { %500 = vst [vmem:[#allocation3 + $0x28] sm:$0xff] %v414_v27  ;;  %504 = vst [vmem:[#allocation3 + $0x48] sm:$0xff] %v426_v28 }
 0x1d0   :  { %v418_v29 = vpop.f32.mrb[22].mxu0  ;;  %v430_v30 = vpop.f32.mrb[2].mxu1 }
 0x1d1   :  { %501 = vst [vmem:[#allocation3 + $0x30] sm:$0xff] %v418_v29  ;;  %505 = vst [vmem:[#allocation3 + $0x50] sm:$0xff] %v430_v30  ;;  %v420_v31 = vpop.f32.mrb[23].mxu0  ;;  %v432_v32 = vpop.f32.mrb[3].mxu1 }
 0x1d2   :  { %502 = vst [vmem:[#allocation3 + $0x38] sm:$0xff] %v420_v31  ;;  %506 = vst [vmem:[#allocation3 + $0x58] sm:$0xff] %v432_v32 }
 0x1d4   :  { %v436_v33 = vpop.f32.mrb[4].mxu1 }
 0x1d5   :  { %507 = vst [vmem:[#allocation3 + $0x60] sm:$0xff] %v436_v33  ;;  %v438_v34 = vpop.f32.mrb[5].mxu1 }
 0x1d6   :  { %508 = vst [vmem:[#allocation3 + $0x68] sm:$0xff] %v438_v34 }
 0x1d8   :  { %v442_v35 = vpop.f32.mrb[6].mxu1 }
 0x1d9   :  { %509 = vst [vmem:[#allocation3 + $0x70] sm:$0xff] %v442_v35  ;;  %v444_v36 = vpop.f32.mrb[7].mxu1 }
 0x1da   :  { %510 = vst [vmem:[#allocation3 + $0x78] sm:$0xff] %v444_v36 }
 0x1dc   :  { %v448_v37 = vpop.f32.mrb[8].mxu1 }
 0x1dd   :  { %511 = vst [vmem:[#allocation3 + $0x80] sm:$0xff] %v448_v37  ;;  %v450_v38 = vpop.f32.mrb[9].mxu1 }
 0x1de   :  { %512 = vst [vmem:[#allocation3 + $0x88] sm:$0xff] %v450_v38 }
 0x1e0   :  { %v454_v39 = vpop.f32.mrb[10].mxu1 }
 0x1e1   :  { %513 = vst [vmem:[#allocation3 + $0x90] sm:$0xff] %v454_v39  ;;  %v456_v40 = vpop.f32.mrb[11].mxu1 }
 0x1e2   :  { %514 = vst [vmem:[#allocation3 + $0x98] sm:$0xff] %v456_v40 }
 0x1e4   :  { %v460_v41 = vpop.f32.mrb[12].mxu1 }
 0x1e5   :  { %515 = vst [vmem:[#allocation3 + $0xa0] sm:$0xff] %v460_v41  ;;  %v462_v42 = vpop.f32.mrb[13].mxu1 }
 0x1e6   :  { %516 = vst [vmem:[#allocation3 + $0xa8] sm:$0xff] %v462_v42 }
 0x1e8   :  { %v466_v43 = vpop.f32.mrb[14].mxu1 }
 0x1e9   :  { %517 = vst [vmem:[#allocation3 + $0xb0] sm:$0xff] %v466_v43  ;;  %v468_v44 = vpop.f32.mrb[15].mxu1 }
 0x1ea   :  { %518 = vst [vmem:[#allocation3 + $0xb8] sm:$0xff] %v468_v44 }
 0x1ec   :  { %v472_v45 = vpop.f32.mrb[16].mxu1 }
 0x1ed   :  { %519 = vst [vmem:[#allocation3 + $0xc0] sm:$0xff] %v472_v45  ;;  %v474_v46 = vpop.f32.mrb[17].mxu1 }
 0x1ee   :  { %520 = vst [vmem:[#allocation3 + $0xc8] sm:$0xff] %v474_v46 }
 0x1f0   :  { %v478_v47 = vpop.f32.mrb[18].mxu1 }
 0x1f1   :  { %521 = vst [vmem:[#allocation3 + $0xd0] sm:$0xff] %v478_v47  ;;  %v480_v48 = vpop.f32.mrb[19].mxu1 }
 0x1f2   :  { %522 = vst [vmem:[#allocation3 + $0xd8] sm:$0xff] %v480_v48 }
 0x1f4   :  { %v484_v49 = vpop.f32.mrb[20].mxu1 }
 0x1f5   :  { %523 = vst [vmem:[#allocation3 + $0xe0] sm:$0xff] %v484_v49  ;;  %v486_v50 = vpop.f32.mrb[21].mxu1 }
 0x1f6   :  { %524 = vst [vmem:[#allocation3 + $0xe8] sm:$0xff] %v486_v50 }
 0x1f8   :  { %v490_v51 = vpop.f32.mrb[22].mxu1 }
 0x1f9   :  { %525 = vst [vmem:[#allocation3 + $0xf0] sm:$0xff] %v490_v51  ;;  %v492_v52 = vpop.f32.mrb[23].mxu1 }
 0x1fa   :  { %526 = vst [vmem:[#allocation3 + $0xf8] sm:$0xff] %v492_v52 }
 0x1fb   :  { %694 = shalt.err (!%p691_p4)
}
 0x1fc   :  { %s695_s11 = scalar_lea.hbm %s930_s3, 4096 }
 0x1fd   :  { %p696_p5 = scmp.ne.s32.totalorder %s930_s3, %s695_s11  ;;  %p699_p6 = scmp.lt.u32.totalorder %s695_s11, %s930_s3 }
 0x1ff   :  { %p701_p7 = pnand %p699_p6, %p696_p5 }
 0x201   :  { %704 = shalt.err (!%p701_p7)
}
 0x202   :  { %s709_s16 = smov 256   ;;  %s710_s17 = smov 16  }
 0x203   :  { %538 = dma.vmem_to_hbm [thread:$0]  %s533_s8, 4096, %s930_s3, [#allocation4], %s709_s16, %s709_s16, %s710_s17  }
 0x204   :  { %705 = dma.done.wait [#allocation4], 4096  }
 0x205   :  { %706 = vsyncadd [#allocation4], 4294963200 }
 0x206   :  { %542 = vsyncpa [#allocation4], 1 }

</bundles_post_ra>
